<compile_context>
chip_gen: v7x
topology: tpu7x:2x2x1
jax: 0.10.0
libtpu: 0.0.40
codegen_flags: <defaults>
</compile_context>

<pallas_src>
import jax
import jax.numpy as jnp
from jax.experimental import pallas as pl
from jax.experimental.pallas import tpu as pltpu

PAD_ID = 0  # ignore_index


def _ce_kernel(logits_ref, tgt_ref, out_ref):
    # logits_ref: (TN, V) native dtype; tgt_ref: (TN, 1) int32 (PAD for tail rows)
    x = logits_ref[...].astype(jnp.float32)            # cast once in VMEM (VPU, hides under DMA)
    t = tgt_ref[...]                                    # (TN, 1)

    # numerically-stable log-sum-exp over the vocab (lane) axis
    m = jnp.max(x, axis=-1, keepdims=True)              # (TN, 1)
    xs = x - m                                           # shifted logits (<= 0 for real rows)
    sumexp = jnp.sum(jnp.exp(xs), axis=-1, keepdims=True)

    # gather the (shifted) target logit via one-hot select (no dynamic gather on TPU);
    # loss = log(sum exp(x - m)) - (x_t - m)
    vocab_ids = jax.lax.broadcasted_iota(jnp.int32, x.shape, 1)
    tgt_shift = jnp.sum(jnp.where(vocab_ids == t, xs, 0.0), axis=-1, keepdims=True)

    valid = t != PAD_ID                                  # PAD targets + OOB tail rows masked here
    per_tok = jnp.where(valid, jnp.log(sumexp) - tgt_shift, 0.0)

    # per-tile partial sum, broadcast into a lane-dense (1, 8, 128) output block
    out_ref[...] = jnp.broadcast_to(jnp.sum(per_tok), out_ref.shape).astype(jnp.float32)


def cross_entropy_loss(logits, src, *, token_tile=None):
    """logits: (B, T, V); src: (B, T+1) int. Returns scalar mean CE (PAD ignored)."""
    B, T, V = logits.shape
    targets = src[:, 1:].astype(jnp.int32)               # (B, T)
    assert targets.shape == (B, T)
    N = B * T

    itemsize = jnp.dtype(logits.dtype).itemsize
    sub = 16 if itemsize == 2 else (32 if itemsize == 1 else 8)  # sublane packing granularity
    if token_tile is None:
        # ~4 MiB per logits block, capped at 512 rows, sublane-aligned
        rows = max(sub, min(512, (4 * 1024 * 1024) // max(1, V * itemsize)))
        rows = max(sub, (rows // sub) * sub)
        if N >= sub:                                      # don't make the block taller than the array
            rows = min(rows, (N // sub) * sub)
        token_tile = rows
    grid = pl.cdiv(N, token_tile)
    Np = grid * token_tile

    # Logits are passed as-is (flattened view, native dtype) -> no HBM copy.
    logits_flat = logits.reshape(N, V)
    # Targets are tiny: pad to a tile multiple with PAD_ID so OOB tail rows self-mask.
    tgt_flat = jnp.full((Np, 1), PAD_ID, jnp.int32).at[:N, 0].set(targets.reshape(N))

    block_bytes = token_tile * V * itemsize
    vmem_limit = int(min(100 * 1024 * 1024,
                         max(32 * 1024 * 1024, 4 * block_bytes + (1 << 20))))

    partials = pl.pallas_call(
        _ce_kernel,
        out_shape=jax.ShapeDtypeStruct((grid, 8, 128), jnp.float32),
        grid_spec=pltpu.PrefetchScalarGridSpec(
            num_scalar_prefetch=0,
            grid=(grid,),
            in_specs=[
                pl.BlockSpec((token_tile, V), lambda i: (i, 0)),
                pl.BlockSpec((token_tile, 1), lambda i: (i, 0)),
            ],
            out_specs=pl.BlockSpec((1, 8, 128), lambda i: (i, 0, 0)),
        ),
        compiler_params=pltpu.CompilerParams(
            dimension_semantics=("parallel",),            # unique output block per step -> safe
            vmem_limit_bytes=vmem_limit,
        ),
    )(logits_flat, tgt_flat)

    loss_sum = jnp.sum(partials[:, 0, 0])                 # tree-reduce partials in f32 (JAX glue)
    count = jnp.sum((targets != PAD_ID).astype(jnp.float32))
    return (loss_sum / count).astype(jnp.float32)


def _reference(logits, src):
    targets = src[:, 1:]
    B, T, V = logits.shape
    x = logits.reshape(B * T, V).astype(jnp.float32)
    t = targets.reshape(B * T)
    lse = jax.nn.logsumexp(x, axis=-1)
    tgt_logit = jnp.take_along_axis(x, t[:, None], axis=-1)[:, 0]
    per_tok = lse - tgt_logit
    valid = (t != PAD_ID)
    return jnp.sum(jnp.where(valid, per_tok, 0.0)) / jnp.sum(valid)


if __name__ == "__main__":
    key = jax.random.PRNGKey(0)
    B, SEQ, V = 2, 8, 32          # src: (B, SEQ); logits: (B, SEQ-1, V)
    k1, k2 = jax.random.split(key)
    logits = jax.random.normal(k1, (B, SEQ - 1, V), dtype=jnp.float32)
    src = jax.random.randint(k2, (B, SEQ), 0, V, dtype=jnp.int32)
    # force a couple of PAD (ignored) positions in the target region
    src = src.at[0, -1].set(PAD_ID).at[1, 3].set(PAD_ID)

    loss = cross_entropy_loss(logits, src)
    jax.block_until_ready(loss)

    ref = _reference(logits, src)
    assert jnp.allclose(loss, ref, atol=1e-5, rtol=1e-5), (loss, ref)
    print("KERNEL_OK")
</pallas_src>

<mosaic_0001>
module attributes {stable_mosaic.version = 11 : i64} {
  func.func @_ce_kernel(%arg0: i32, %arg1: memref<8x32xf32, #tpu.memory_space<vmem>>, %arg2: memref<8x1xi32, #tpu.memory_space<vmem>>, %arg3: memref<1x8x128xf32, #tpu.memory_space<vmem>>) attributes {dimension_semantics = [#tpu.dimension_semantics<parallel>], iteration_bounds = array<i64: 2>, scalar_prefetch = 0 : i64, scratch_operands = 0 : i64, tpu.core_type = #tpu.core_type<tc>, window_params = [{transform_indices = @transform_0, window_bounds = array<i64: 8, 32>}, {transform_indices = @transform_1, window_bounds = array<i64: 8, 1>}, {transform_indices = @transform_2, window_bounds = array<i64: 1, 8, 128>}]} {
    %c0 = arith.constant 0 : index
    %c0_0 = arith.constant 0 : index
    %0 = vector.load %arg1[%c0, %c0_0] : memref<8x32xf32, #tpu.memory_space<vmem>>, vector<8x32xf32>
    %c0_1 = arith.constant 0 : index
    %c0_2 = arith.constant 0 : index
    %1 = vector.load %arg2[%c0_1, %c0_2] : memref<8x1xi32, #tpu.memory_space<vmem>>, vector<8x1xi32>
    %cst = arith.constant dense<0xFF800000> : vector<8xf32>
    %2 = vector.multi_reduction <maximumf>, %0, %cst [1] : vector<8x32xf32> to vector<8xf32>
    %3 = vector.shape_cast %2 : vector<8xf32> to vector<8x1xf32>
    %4 = vector.broadcast %3 : vector<8x1xf32> to vector<8x32xf32>
    %5 = arith.subf %0, %4 : vector<8x32xf32>
    %6 = math.exp %5 : vector<8x32xf32>
    %cst_3 = arith.constant dense<0.000000e+00> : vector<8xf32>
    %7 = vector.multi_reduction <add>, %6, %cst_3 [1] : vector<8x32xf32> to vector<8xf32>
    %8 = vector.shape_cast %7 : vector<8xf32> to vector<8x1xf32>
    %9 = tpu.iota {dimensions = array<i32: 1>} : vector<8x32xi32>
    %10 = vector.broadcast %1 : vector<8x1xi32> to vector<8x32xi32>
    %11 = arith.cmpi eq, %9, %10 : vector<8x32xi32>
    %cst_4 = arith.constant 0.000000e+00 : f32
    %12 = vector.broadcast %cst_4 : f32 to vector<8x32xf32>
    %13 = arith.select %11, %5, %12 : vector<8x32xi1>, vector<8x32xf32>
    %cst_5 = arith.constant dense<0.000000e+00> : vector<8xf32>
    %14 = vector.multi_reduction <add>, %13, %cst_5 [1] : vector<8x32xf32> to vector<8xf32>
    %15 = vector.shape_cast %14 : vector<8xf32> to vector<8x1xf32>
    %c0_i32 = arith.constant 0 : i32
    %16 = vector.broadcast %c0_i32 : i32 to vector<8x1xi32>
    %17 = arith.cmpi ne, %1, %16 : vector<8x1xi32>
    %18 = math.log %8 : vector<8x1xf32>
    %19 = arith.subf %18, %15 : vector<8x1xf32>
    %cst_6 = arith.constant 0.000000e+00 : f32
    %20 = vector.broadcast %cst_6 : f32 to vector<8x1xf32>
    %21 = arith.select %17, %19, %20 : vector<8x1xi1>, vector<8x1xf32>
    %22 = vector.shape_cast %21 : vector<8x1xf32> to vector<1x8x1xf32>
    %cst_7 = arith.constant dense<0.000000e+00> : vector<1xf32>
    %23 = vector.multi_reduction <add>, %22, %cst_7 [1, 2] : vector<1x8x1xf32> to vector<1xf32>
    %24 = vector.shape_cast %23 : vector<1xf32> to vector<1x1x1xf32>
    %25 = vector.extract %24[0, 0, 0] : f32 from vector<1x1x1xf32>
    %26 = vector.broadcast %25 : f32 to vector<1x8x128xf32>
    %c0_8 = arith.constant 0 : index
    %c0_9 = arith.constant 0 : index
    %c0_10 = arith.constant 0 : index
    %27 = vector.load %arg3[%c0_8, %c0_9, %c0_10] : memref<1x8x128xf32, #tpu.memory_space<vmem>>, vector<1x8x128xf32>
    tpu.vector_store %arg3[%c0_8, %c0_9, %c0_10], %26 {strides = array<i32>} : memref<1x8x128xf32, #tpu.memory_space<vmem>>, vector<1x8x128xf32>,
    return
  }
  func.func @transform_0(%arg0: i32) -> (i32, i32) {
    %c0_i32 = arith.constant 0 : i32
    %c0_i32_0 = arith.constant 0 : i32
    return %arg0, %c0_i32 : i32, i32
  }
  func.func @transform_1(%arg0: i32) -> (i32, i32) {
    %c0_i32 = arith.constant 0 : i32
    %c0_i32_0 = arith.constant 0 : i32
    return %arg0, %c0_i32 : i32, i32
  }
  func.func @transform_2(%arg0: i32) -> (i32, i32, i32) {
    %c0_i32 = arith.constant 0 : i32
    %c0_i32_0 = arith.constant 0 : i32
    %c0_i32_1 = arith.constant 0 : i32
    return %arg0, %c0_i32, %c0_i32_0 : i32, i32, i32
  }
}

</mosaic_0001>

<bundles_post_ra>
// kernel: tpu_custom_call.1
= control target key start
LH: loop header
LB: loop body
LE: loop exit
PB: predicated region body
PF: predicated region fallthrough
CT: control target
= control target key end

     0   :  { %7 = vsyncpa [#allocation3], 0  ;;  %s526_s0 = inlined_call_operand.vmem [shape: f32[14,32], index: 0, kind: input, shape index: {}]   ;;  %s527_s1 = inlined_call_operand.vmem [shape: s32[16,1], index: 1, kind: input, shape index: {}]   ;;  %s528_s2 = inlined_call_operand.hbm [shape: f32[2,8,128], index: 2, kind: output, shape index: {}]  }
   0x1   :  { %9 = vsyncpa [#allocation3 + $0x1], 0  ;;  %s420_s9 = smov 0   ;;  %s422_s10 = smov 0  }
   0x2   :  { %s424_s11 = smov 0   ;;  %s426_s12 = smov 0  }
   0x3 LB: > { %s441_s13 = sadd.s32 4294967295, %s401_s12   ;;  %s281_s14 = sadd.s32 4294967294, %s401_s12   ;;  %s401_s12 = sphi %s426_s12, %s534_s12   ;;  %s397_s11 = sphi %s424_s11, %s533_s11   ;;  %s393_s10 = sphi %s422_s10, %s532_s10   ;;  %s389_s9 = sphi %s420_s9, %s531_s9  }
   0x4   : > { %s445_s15 = sadd.s32 1, %s401_s12   ;;  %s74_s16 = sadd.s32 1, %s397_s11 }
   0x5   : > { %s71_s17 = ssub.s32 %s401_s12, %s445_s15  ;;  %p84_p0 = scmp.ne.s32.totalorder %s397_s11, %s393_s10 }
   0x6   : > { %p72_p1 = scmp.eq.s32.totalorder %s71_s17, 0  ;;  %p85_p2 = scmp.eq.s32.totalorder %s441_s13, 1 }
   0x7   : > { %p90_p3 = scmp.ne.s32.totalorder %s393_s10, %s389_s9  ;;  %p91_p4 = scmp.eq.s32.totalorder %s281_s14, 1 }
   0x8   : > { %s456_s18 = scalar_select %p72_p1, %s397_s11, %s74_s16  }
   0x9   : > { %p458_p5 = por %p85_p2, %p84_p0  ;;  %p462_p6 = por %p91_p4, %p90_p3 }
   0xa   : > { %p284_p7 = scmp.ge.s32.totalorder %s401_s12, 1  ;;  %p123_p8 = scmp.lt.s32.totalorder %s401_s12, 3 }
   0xc   : > { %p124_p9 = pnand %p284_p7, %p123_p8 }
   0xd   : > { %p148_p10 = scmp.lt.s32.totalorder (!%p124_p9), %s441_s13, 1  ;;  %v403_v0 = vmov (!%p124_p9), 0   ;;  %vm158_vm0 = vcmask (!%p124_p9), 261120   ;;  %v168_v7 = vlaneseq (!%p124_p9)  ;;  %vm183_vm3 = vcmask (!%p124_p9), 7168   ;;  %s145_s29 = sand.u32 (!%p124_p9), 1, %s393_s10  }
   0xe   : > { %127 = sbr.rel (%p124_p9) target bundleno = 563 (0x233), region = 28  ;;  %334 = vset.pattern.permute.xlu0 (!%p124_p9), %v403_v0  ;;  %s285_s30 = sshll.u32 (!%p124_p9), %s145_s29, 3 }
   0xf   : > { %v169_v8 = vand.u32 (!%p124_p9), 127, %v168_v7  ;;  %s147_s3 = scalar_lea.vmem (!%p124_p9), [#allocation2], %s285_s30  ;;  %s289_s5 = sshll.u32 (!%p124_p9), %s441_s13, 7 }
  0x10   : > { %s210_s4 = sshll.u32 (!%p124_p9), %s147_s3, 4  ;;  %s486_s14 = scalar_lea.hbm (!%p124_p9), %s528_s2, %s289_s5  ;;  %s481_s4 = int_to_ptr.vmem [resolvable:$true] %s210_s4 }
  0x11   : > { %s197_s16 = scalar_lea.sflag (!%p124_p9), [#allocation3], %s145_s29  ;;  %s339_s17 = scalar_lea.vmem (!%p124_p9), %s481_s4, 128 }
  0x12   : > { %p340_p11 = scmp.ne.s32.totalorder (!%p124_p9), %s481_s4, %s339_s17 }
  0x14   : > { %p341_p12 = pnand (!%p124_p9), %p340_p11, %p458_p5 }
  0x15   : > { %s149_s21 = scalar_select %p148_p10, %s441_s13, 1 }
  0x16   : > { %p342_p13 = pneg %p341_p12  ;;  %s404_s13 = smov [#allocation2]  }
  0x17   : > { %s286_s22 = sshll.u32 %s149_s21, 3  ;;  %s343_s21 = sshll.u32 %s404_s13, 4  ;;  %s344_s21 = int_to_ptr.vmem [resolvable:$false] %s343_s21 }
  0x18   : > { %s151_s25 = scalar_lea.vmem %s526_s0, %s286_s22  ;;  %s155_s28 = scalar_lea.vmem %s527_s1, %s286_s22 }
  0x19   : > { %v156_v1 = vld [vmem:[%s151_s25] sm:$0xff]  ;;  %s345_s22 = scalar_lea.vmem %s344_s21, 256  ;;  %p346_p0 = scmp.lt.s32.totalorder %s481_s4, %s344_s21 }
  0x1a   : > { %v159_v2 = vsel %vm158_vm0, %v156_v1, -inf  ;;  %v157_v3 = vld [vmem:[%s155_s28] sm:$0xff]  ;;  %p347_p1 = scmp.lt.s32.totalorder %s345_s22, %s339_s17 }
  0x1b   : > { %160 = vmax.xlane.f32.xlu0 %v159_v2  ;;  %vm178_vm2 = vcmp.ne.s32.totalorder %v157_v3, 0 }
  0x1c   : > { %p348_p2 = por %p347_p1, %p346_p0 }
  0x1e   : > { %p349_p3 = pnand %p348_p2, %p342_p13 }
  0x31   : > { %171 = vperm.xlu0 %334, %v157_v3  }
  0xa8   : > { %v161_v4 = vpop.xlane.xlu0 %160 }
  0xa9   : > { %v162_v5 = vsub.f32 %v156_v1, %v161_v4 }
  0xab   : > { %v163_v6 = vmul.f32 1.442695, %v162_v5 }
  0xad   : > { %335 = vpow2.f32 %v163_v6 }
  0xb0   : > { %v172_v9 = vpop.permute.xlu0 %171 }
  0xb1   : > { %vm173_vm1 = vcmp.eq.s32.totalorder %v169_v8, %v172_v9 }
  0xb2   : > { %v174_v12 = vsel %vm173_vm1, %v162_v5, 0.0 }
  0xb3   : > { %v175_v13 = vsel %vm158_vm0, %v174_v12, 0.0 }
  0xb7   : > { %v336_v10 = vpop.eup %335 }
  0xb8   : > { %v165_v11 = vsel %vm158_vm0, %v336_v10, 0.0 }
  0xb9   : > { %166 = vadd.xlane.f32.xlu1 %v165_v11 }
  0xbd   : > { %176 = vadd.xlane.f32.xlu1 %v175_v13 }
 0x146   : > { %v167_v14 = vpop.xlane.xlu1 %166 }
 0x147   : > { %337 = vlog2.f32 %v167_v14 }
 0x14a   : > { %v177_v17 = vpop.xlane.xlu1 %176 }
 0x151   : > { %v338_v15 = vpop.eup %337 }
 0x152   : > { %v180_v16 = vmul.f32 0.6931472, %v338_v15 }
 0x154   : > { %v181_v18 = vsub.f32 %v180_v16, %v177_v17 }
 0x156   : > { %v182_v19 = vsel %vm178_vm2, %v181_v18, 0.0 }
 0x157   : > { %v184_v20 = vsel %vm183_vm3, %v182_v19, 0.0 }
 0x158   : > { %185 = vadd.xlane.f32.xlu1 %v184_v20 }
 0x1e5   : > { %v186_v21 = vpop.xlane.xlu1 %185 }
 0x1e6   : > { %v187_v22 = vrot.slane %v186_v21, 4 }
 0x1e8   : > { %v188_v23 = vadd.f32 %v187_v22, %v186_v21 }
 0x1ea   : > { %v189_v24 = vrot.slane %v188_v23, 2 }
 0x1ec   : > { %v190_v25 = vadd.f32 %v189_v24, %v188_v23 }
 0x1ee   : > { %v191_v26 = vrot.slane %v190_v25, 1 }
 0x1f0   : > { %v192_v27 = vadd.f32 %v191_v26, %v190_v25 }
 0x1f2   : > { %292 = vpush %v192_v27 }
 0x223   : > { %s293_s6 = spop %292 }
 0x224   : > { %v194_v28 = vstv %s293_s6 }
 0x225   : > { %195 = vst [vmem:[%s147_s3] sm:$0xff] %v194_v28 }
 0x226   : > { %352 = shalt.err (!%p349_p3)
}
 0x227   : > { %s353_s23 = scalar_lea.hbm %s486_s14, 128  ;;  %s357_s26 = scalar_lea.hbm %s528_s2, 256 }
 0x228   : > { %p354_p4 = scmp.ne.s32.totalorder %s486_s14, %s353_s23  ;;  %p358_p9 = scmp.lt.u32.totalorder %s486_s14, %s528_s2 }
 0x229   : > { %p359_p10 = scmp.lt.u32.totalorder %s357_s26, %s353_s23  ;;  %p361_p12 = scmp.lt.u32.totalorder %s353_s23, %s486_s14 }
 0x22a   : > { %p355_p7 = pnand %p354_p4, %p458_p5 }
 0x22b   : > { %p360_p11 = por %p359_p10, %p358_p9 }
 0x22c   : > { %p356_p8 = pneg %p355_p7 }
 0x22d   : > { %p362_p13 = por %p361_p12, %p360_p11 }
 0x22f   : > { %p363_p0 = pnand %p362_p13, %p356_p8 }
 0x231   : > { %366 = shalt.err (!%p363_p0)
}
 0x232   : > { %294 = dma.vmem_to_hbm [thread:$0]  (%p458_p5), %s481_s4, 128, %s486_s14, %s197_s16  }
 0x233 PF: > { %p300_p1 = scmp.ge.s32.totalorder %s401_s12, 2  ;;  %s222_s29 = sand.u32 1, %s389_s9  }
 0x234   : > { %s223_s30 = scalar_lea.sflag [#allocation3], %s222_s29 }
 0x235   : > { %p297_p2 = pnand %p300_p1, %p462_p6 }
 0x237   : > { %384 = dma.done.wait (!%p297_p2), %s223_s30, 128  }
 0x238   : > { %386 = vsyncadd (!%p297_p2), %s223_s30, 4294967168  ;;  %p12_p3 = scmp.ge.s32.totalorder %s445_s15, 4   ;;  %s531_s9 = smov %s393_s10 }
 0x239   : > { %s532_s10 = smov %s397_s11  ;;  %s533_s11 = smov %s456_s18 }
 0x23a   : > { %s534_s12 = smov %s445_s15  ;;  %14 = sbr.rel (!%p12_p3) target bundleno = 3 (0x3), region = 66 }
 0x241   :  { %228 = vsyncpa [#allocation3], 1 }
 0x242   :  { %230 = vsyncpa [#allocation3 + $0x1], 1 }

</bundles_post_ra>
